<compile_context>
chip_gen: v7x
topology: tpu7x:2x2x1
jax: 0.10.0
libtpu: 0.0.40
codegen_flags: <defaults>
</compile_context>

<pallas_src>
import functools

import jax
import jax.numpy as jnp
from jax.experimental import pallas as pl
from jax.experimental.pallas import tpu as pltpu


def _vmem_capacity_bytes():
    try:
        return int(pltpu.get_tpu_info().vmem_capacity_bytes)
    except Exception:
        return 64 << 20  # conservative fallback (v7x per-core VMEM)


def _choose_lane_tile(L, target):
    """Largest legal lane tile <= target (or the full extent)."""
    if L % 128 != 0:
        return L  # full-extent lane block: exempt from the 128-lane rule
    if L <= target:
        return L
    t = target - (target % 128)
    for cand in range(t, 127, -128):
        if L % cand == 0:
            return cand
    return 128


def _conv1x1_bn_relu_kernel(w_ref, x_ref, b_ref, o_ref):
    """relu(W @ x + b) for one (bn, tco, tl) output tile.

    w_ref: (tco, Cin)     BN scale folded in; grid-invariant along n/l axes.
    x_ref: (bn, Cin, tl)  spatial tile of `bn` batch elements (NCHW layout).
    b_ref: (tco, 1)       folded BN bias column (broadcast across lanes).
    o_ref: (bn, tco, tl)
    """
    w = w_ref[...]
    b = b_ref[...]
    for i in range(o_ref.shape[0]):  # bn is small & static -> unrolled at trace
        acc = jnp.dot(w, x_ref[i], preferred_element_type=jnp.float32)
        o_ref[i] = jnp.maximum(acc + b, 0.0).astype(o_ref.dtype)


@functools.partial(jax.jit, static_argnames=("tl", "bn", "tco"))
def conv1x1_bn_relu(x_nchw, weight_oi, gamma, beta, running_mean, running_var,
                    eps=1e-5, *, tl=None, bn=None, tco=None):
    """Fused 1x1 conv (bias=False) + BatchNorm (running stats) + ReLU.

    x_nchw:    (N, Cin, H, W)
    weight_oi: (Cout, Cin)  -- Conv2d weight with the trailing 1x1 dims dropped
    gamma, beta, running_mean, running_var: (Cout,)
    """
    N, Cin, H, W = x_nchw.shape
    Cout = weight_oi.shape[0]
    L = H * W

    # Fold BN into a scaled weight and a per-channel bias column.
    scale = gamma / jnp.sqrt(running_var + eps)                    # (Cout,)
    w_scaled = (weight_oi * scale[:, None]).astype(jnp.float32)    # (Cout, Cin)
    bias_col = (beta - running_mean * scale)[:, None].astype(jnp.float32)

    # NCHW -> (N, Cin, H*W): pure metadata reshape, no HBM transpose or pad.
    x3d = x_nchw.reshape(N, Cin, L)
    out_dtype = x_nchw.dtype

    in_i = jnp.dtype(x3d.dtype).itemsize
    w_i = jnp.dtype(w_scaled.dtype).itemsize
    out_i = jnp.dtype(out_dtype).itemsize

    # ---- generation-aware VMEM budget --------------------------------------
    vmem_cap = (3 * _vmem_capacity_bytes()) // 4   # headroom for compiler scratch
    weight_foot = 2 * Cout * Cin * w_i + 2 * Cout * 4   # Pallas double-buffers
    budget = max(vmem_cap - weight_foot - (4 << 20), 2 << 20)

    # ---- lane tile: as big as the budget allows ------------------------------
    if tl is None:
        per_lane = 2 * (Cin * in_i + Cout * out_i)       # double-buffered x + out
        target = max(512, min(8192, budget // per_lane))
        target -= target % 128
        tl = _choose_lane_tile(L, max(target, 128))
    else:
        assert tl == L or (tl % 128 == 0 and L % tl == 0), (
            "tl must equal H*W or be a 128-multiple divisor of H*W")
    lane_tiles = L // tl

    # ---- pack batch elements when there are too few lane tiles per image ----
    if bn is None:
        bn = 1
        if lane_tiles <= 2:
            for cand in range(min(N, 8), 1, -1):
                if N % cand:
                    continue
                if 2 * cand * tl * (Cin * in_i + Cout * out_i) <= budget:
                    bn = cand
                    break
    assert N % bn == 0

    # ---- split Cout when the (batch x lane) grid collapses to one step ------
    if tco is None:
        tco = Cout
        if (N // bn) * lane_tiles == 1 and Cout % 16 == 0:
            tco = Cout // 2
    assert Cout % tco == 0 and (tco % 8 == 0 or tco == Cout)

    # ---- VMEM accounting (drives vmem_limit; errors instead of clamping) ----
    vmem_need = (2 * bn * Cin * tl * in_i        # x tiles (double-buffered)
                 + 2 * bn * tco * tl * out_i     # out tiles (double-buffered)
                 + 2 * tco * Cin * w_i           # weight (2 buffers, resident)
                 + 2 * tco * 4                   # bias column
                 + (2 << 20))                    # slack
    if vmem_need > vmem_cap:
        raise ValueError(
            f"conv1x1_bn_relu tiling needs ~{vmem_need >> 20} MiB VMEM but only "
            f"~{vmem_cap >> 20} MiB is usable; reduce tl/bn/tco.")
    vmem_limit = int(min(max(vmem_need, 16 << 20), vmem_cap))

    grid = (N // bn, lane_tiles, Cout // tco)
    out3d = pl.pallas_call(
        _conv1x1_bn_relu_kernel,
        out_shape=jax.ShapeDtypeStruct((N, Cout, L), out_dtype),
        grid_spec=pltpu.PrefetchScalarGridSpec(
            num_scalar_prefetch=0,
            grid=grid,
            in_specs=[
                # Weight: invariant along n/l -> DMA'd once per Cout block.
                pl.BlockSpec((tco, Cin), lambda n, l, co: (co, 0)),
                # Activations: revisited across the innermost co axis.
                pl.BlockSpec((bn, Cin, tl), lambda n, l, co: (n, 0, l)),
                # Folded BN bias column.
                pl.BlockSpec((tco, 1), lambda n, l, co: (co, 0)),
            ],
            out_specs=pl.BlockSpec((bn, tco, tl), lambda n, l, co: (n, co, l)),
        ),
        compiler_params=pltpu.CompilerParams(
            dimension_semantics=("parallel", "parallel", "parallel"),
            vmem_limit_bytes=vmem_limit,
        ),
    )(w_scaled, x3d, bias_col)

    return out3d.reshape(N, Cout, H, W)


def reference(x_nchw, weight_oi, gamma, beta, rmean, rvar, eps):
    y = jnp.einsum("nchw,oc->nohw", x_nchw, weight_oi)
    inv = gamma / jnp.sqrt(rvar + eps)
    y = y * inv[None, :, None, None] + (beta - rmean * inv)[None, :, None, None]
    return jnp.maximum(y, 0.0)


if __name__ == "__main__":
    eps = 1e-5
    key = jax.random.PRNGKey(0)
    kx, kw, kg, kb, km, kv, kx2, kx3 = jax.random.split(key, 8)

    # Small shapes consistent with the module (1x1 conv, Cin == Cout, BN, ReLU).
    C = 128
    weight = jax.random.normal(kw, (C, C), dtype=jnp.float32) * (1.0 / jnp.sqrt(C))
    gamma = 1.0 + 0.1 * jax.random.normal(kg, (C,), dtype=jnp.float32)
    beta = 0.1 * jax.random.normal(kb, (C,), dtype=jnp.float32)
    running_mean = 0.05 * jax.random.normal(km, (C,), dtype=jnp.float32)
    running_var = 1.0 + 0.1 * jax.random.uniform(kv, (C,), dtype=jnp.float32)

    def check(x, **overrides):
        out = jax.block_until_ready(
            conv1x1_bn_relu(x, weight, gamma, beta, running_mean, running_var,
                            eps, **overrides))
        ref = reference(x, weight, gamma, beta, running_mean, running_var, eps)
        assert out.shape == ref.shape
        assert jnp.allclose(out, ref, atol=1e-4, rtol=1e-4), float(
            jnp.max(jnp.abs(out - ref)))

    # (a) aligned spatial size (L=256): exercises batch packing + Cout split.
    check(jax.random.normal(kx, (2, C, 16, 16), dtype=jnp.float32))
    # (b) 14x14 (L=196, not a 128-multiple, like the real module): full-extent
    #     lane block, no pad / slice passes.
    check(jax.random.normal(kx2, (1, C, 14, 14), dtype=jnp.float32))
    # (c) larger spatial size with an explicit lane tile: multi-lane-tile path.
    check(jax.random.normal(kx3, (1, C, 32, 64), dtype=jnp.float32), tl=512)

    print("KERNEL_OK")
</pallas_src>

<mosaic_0001>
module attributes {stable_mosaic.version = 11 : i64} {
  func.func @_conv1x1_bn_relu_kernel(%arg0: i32, %arg1: i32, %arg2: i32, %arg3: memref<64x128xf32, #tpu.memory_space<vmem>>, %arg4: memref<2x128x256xf32, #tpu.memory_space<vmem>>, %arg5: memref<64x1xf32, #tpu.memory_space<vmem>>, %arg6: memref<2x64x256xf32, #tpu.memory_space<vmem>>) attributes {dimension_semantics = [#tpu.dimension_semantics<parallel>, #tpu.dimension_semantics<parallel>, #tpu.dimension_semantics<parallel>], iteration_bounds = array<i64: 1, 1, 2>, scalar_prefetch = 0 : i64, scratch_operands = 0 : i64, tpu.core_type = #tpu.core_type<tc>, window_params = [{transform_indices = @transform_0, window_bounds = array<i64: 64, 128>}, {transform_indices = @transform_1, window_bounds = array<i64: 2, 128, 256>}, {transform_indices = @transform_2, window_bounds = array<i64: 64, 1>}, {transform_indices = @transform_3, window_bounds = array<i64: 2, 64, 256>}]} {
    %c0 = arith.constant 0 : index
    %c0_0 = arith.constant 0 : index
    %0 = vector.load %arg3[%c0, %c0_0] : memref<64x128xf32, #tpu.memory_space<vmem>>, vector<64x128xf32>
    %c0_1 = arith.constant 0 : index
    %c0_2 = arith.constant 0 : index
    %1 = vector.load %arg5[%c0_1, %c0_2] : memref<64x1xf32, #tpu.memory_space<vmem>>, vector<64x1xf32>
    %c0_3 = arith.constant 0 : index
    %c0_4 = arith.constant 0 : index
    %c0_5 = arith.constant 0 : index
    %2 = vector.load %arg4[%c0_3, %c0_4, %c0_5] : memref<2x128x256xf32, #tpu.memory_space<vmem>>, vector<1x128x256xf32>
    %3 = vector.shape_cast %2 : vector<1x128x256xf32> to vector<128x256xf32>
    %cst = arith.constant dense<0.000000e+00> : vector<64x256xf32>
    %4 = tpu.matmul %0, %3, %cst {dimension_numbers = #tpu.dot_dimension_numbers<[1], [0], [0], [1], [0, 0, 1, 1], [], []>} : vector<64x128xf32>, vector<128x256xf32>, vector<64x256xf32> -> vector<64x256xf32>
    %5 = vector.broadcast %1 : vector<64x1xf32> to vector<64x256xf32>
    %6 = arith.addf %4, %5 : vector<64x256xf32>
    %cst_6 = arith.constant 0.000000e+00 : f32
    %7 = vector.broadcast %cst_6 : f32 to vector<64x256xf32>
    %8 = arith.maximumf %6, %7 : vector<64x256xf32>
    %c0_7 = arith.constant 0 : index
    %c0_8 = arith.constant 0 : index
    %c0_9 = arith.constant 0 : index
    %9 = vector.load %arg6[%c0_7, %c0_8, %c0_9] : memref<2x64x256xf32, #tpu.memory_space<vmem>>, vector<1x64x256xf32>
    %10 = vector.shape_cast %9 : vector<1x64x256xf32> to vector<64x256xf32>
    %11 = vector.shape_cast %8 : vector<64x256xf32> to vector<1x64x256xf32>
    tpu.vector_store %arg6[%c0_7, %c0_8, %c0_9], %11 {strides = array<i32>} : memref<2x64x256xf32, #tpu.memory_space<vmem>>, vector<1x64x256xf32>,
    %c1 = arith.constant 1 : index
    %c0_10 = arith.constant 0 : index
    %c0_11 = arith.constant 0 : index
    %12 = vector.load %arg4[%c1, %c0_10, %c0_11] : memref<2x128x256xf32, #tpu.memory_space<vmem>>, vector<1x128x256xf32>
    %13 = vector.shape_cast %12 : vector<1x128x256xf32> to vector<128x256xf32>
    %cst_12 = arith.constant dense<0.000000e+00> : vector<64x256xf32>
    %14 = tpu.matmul %0, %13, %cst_12 {dimension_numbers = #tpu.dot_dimension_numbers<[1], [0], [0], [1], [0, 0, 1, 1], [], []>} : vector<64x128xf32>, vector<128x256xf32>, vector<64x256xf32> -> vector<64x256xf32>
    %15 = vector.broadcast %1 : vector<64x1xf32> to vector<64x256xf32>
    %16 = arith.addf %14, %15 : vector<64x256xf32>
    %cst_13 = arith.constant 0.000000e+00 : f32
    %17 = vector.broadcast %cst_13 : f32 to vector<64x256xf32>
    %18 = arith.maximumf %16, %17 : vector<64x256xf32>
    %c1_14 = arith.constant 1 : index
    %c0_15 = arith.constant 0 : index
    %c0_16 = arith.constant 0 : index
    %19 = vector.load %arg6[%c1_14, %c0_15, %c0_16] : memref<2x64x256xf32, #tpu.memory_space<vmem>>, vector<1x64x256xf32>
    %20 = vector.shape_cast %19 : vector<1x64x256xf32> to vector<64x256xf32>
    %21 = vector.shape_cast %18 : vector<64x256xf32> to vector<1x64x256xf32>
    tpu.vector_store %arg6[%c1_14, %c0_15, %c0_16], %21 {strides = array<i32>} : memref<2x64x256xf32, #tpu.memory_space<vmem>>, vector<1x64x256xf32>,
    return
  }
  func.func @transform_0(%arg0: i32, %arg1: i32, %arg2: i32) -> (i32, i32) {
    %c0_i32 = arith.constant 0 : i32
    %c0_i32_0 = arith.constant 0 : i32
    return %arg2, %c0_i32 : i32, i32
  }
  func.func @transform_1(%arg0: i32, %arg1: i32, %arg2: i32) -> (i32, i32, i32) {
    %c0_i32 = arith.constant 0 : i32
    %c0_i32_0 = arith.constant 0 : i32
    return %arg0, %c0_i32, %arg1 : i32, i32, i32
  }
  func.func @transform_2(%arg0: i32, %arg1: i32, %arg2: i32) -> (i32, i32) {
    %c0_i32 = arith.constant 0 : i32
    %c0_i32_0 = arith.constant 0 : i32
    return %arg2, %c0_i32 : i32, i32
  }
  func.func @transform_3(%arg0: i32, %arg1: i32, %arg2: i32) -> (i32, i32, i32) {
    %c0_i32 = arith.constant 0 : i32
    return %arg0, %arg2, %arg1 : i32, i32, i32
  }
}

</mosaic_0001>

<bundles_post_ra>
// kernel: conv1x1_bn_relu.1
= control target key start
LH: loop header
LB: loop body
LE: loop exit
PB: predicated region body
PF: predicated region fallthrough
CT: control target
= control target key end

     0   :  { %s1100_s12 = smov 0   ;;  %s1102_s13 = smov 0   ;;  %s1513_s0 = inlined_call_operand.vmem [shape: f32[128,128], index: 0, kind: input, shape index: {}]   ;;  %s1514_s1 = inlined_call_operand.vmem [shape: f32[2,128,256], index: 1, kind: input, shape index: {}]   ;;  %s1515_s2 = inlined_call_operand.vmem [shape: f32[128,1], index: 2, kind: input, shape index: {}]   ;;  %s1516_s3 = inlined_call_operand.vmem [shape: f32[2,128,256], index: 3, kind: output, shape index: {}]  }
   0x1   :  { %s1104_s14 = smov 0   ;;  %s1106_s15 = smov 0  }
   0x2   :  { %s1108_s16 = smov 0  }
   0x3 LB: > { %s863_s17 = sadd.s32 4294967295, %s1076_s16   ;;  %s25_s18 = sadd.s32 1, %s1072_s15  ;;  %s1076_s16 = sphi %s1108_s16, %s13_s16   ;;  %s1072_s15 = sphi %s1106_s15, %s1522_s15   ;;  %s1068_s14 = sphi %s1104_s14, %s1521_s14   ;;  %s1064_s13 = sphi %s1102_s13, %s1520_s13   ;;  %s1060_s12 = sphi %s1100_s12, %s1519_s12  }
   0x4   : > { %p26_p0 = scmp.ge.s32.totalorder %s25_s18, 2  ;;  %s123_s19 = sadd.s32 1, %s1064_s13 }
   0x5   : > { %p133_p1 = scmp.ne.s32.totalorder %s1064_s13, %s1060_s12  ;;  %p134_p2 = scmp.eq.s32.totalorder %s863_s17, 1 }
   0x6   : > { %s1524_s18 = smov (%p26_p0, %s25_s18), 0  ;;  %p868_p4 = scmp.ge.s32.totalorder %s1076_s16, 1 }
   0x7   : > { %p1132_p3 = por %p134_p2, %p133_p1  ;;  %s117_s21 = ssub.s32 %s1072_s15, %s1524_s18 }
   0x8   : > { %p191_p5 = scmp.lt.s32.totalorder %s1076_s16, 3  ;;  %p121_p6 = scmp.eq.s32.totalorder %s117_s21, 0 }
   0xa   : > { %p192_p7 = pnand %p868_p4, %p191_p5 }
   0xb   : > { %s1141_s22 = scalar_select %p121_p6, %s1064_s13, %s123_s19  }
   0xc   : > { %195 = sbr.rel (%p192_p7) target bundleno = 302 (0x12e), region = 32  ;;  %v273_v0 = vld [vmem:[%s1514_s1 + $0x8] sm:$0xff] (!%p192_p7)  ;;  %v275_v1 = vld [vmem:[%s1514_s1 + $0x18] sm:$0xff] (!%p192_p7)  ;;  %v272_v5 = vld [vmem:[%s1514_s1] sm:$0xff] (!%p192_p7)  ;;  %v1078_v7 = vmov (!%p192_p7), 0.0   ;;  %v1079_v13 = vmov (!%p192_p7), 0  }
   0xd   : > { %v875_v2 = vld [vmem:[%s1514_s1 + $0x108] sm:$0xff] (!%p192_p7)  ;;  %v930_v3 = vpack.c.bf16 (!%p192_p7), %v275_v1, %v273_v0  ;;  %v877_v4 = vld [vmem:[%s1514_s1 + $0x118] sm:$0xff] (!%p192_p7)  ;;  %v274_v6 = vld [vmem:[%s1514_s1 + $0x10] sm:$0xff] (!%p192_p7)  ;;  %408 = vmatprep.mubr.f32.mxu0 (!%p192_p7), %v1078_v7  ;;  %586 = vmatprep.mubr.f32.mxu1 (!%p192_p7), %v1078_v7  ;;  %s870_s26 = sshll.u32 (!%p192_p7), %s1068_s14, 3 }
   0xe   : > { %v962_v8 = vpack.c.bf16 (!%p192_p7), %v877_v4, %v875_v2  ;;  %v932_v9 = vpack.c.bf16 (!%p192_p7), %v274_v6, %v272_v5  ;;  %v874_v10 = vld [vmem:[%s1514_s1 + $0x100] sm:$0xff] (!%p192_p7)  ;;  %v876_v11 = vld [vmem:[%s1514_s1 + $0x110] sm:$0xff] (!%p192_p7)  ;;  %v277_v12 = vld [vmem:[%s1514_s1 + $0x28] sm:$0xff] (!%p192_p7)  ;;  %1036 = vset.pattern.permute.xlu0 (!%p192_p7), %v1079_v13  ;;  %1037 = vset.pattern.permute.xlu1 (!%p192_p7), %v1079_v13  ;;  %p1254_p8 = scmp.lt.s32.totalorder (!%p192_p7), %s870_s26, 15 }
   0xf   : > { %931 = vmatprep.subr.bf16.mxu0 (!%p192_p7), %v930_v3  ;;  %v964_v14 = vpack.c.bf16 (!%p192_p7), %v876_v11, %v874_v10  ;;  %v279_v15 = vld [vmem:[%s1514_s1 + $0x38] sm:$0xff] (!%p192_p7)  ;;  %v879_v16 = vld [vmem:[%s1514_s1 + $0x128] sm:$0xff] (!%p192_p7)  ;;  %v276_v20 = vld [vmem:[%s1514_s1 + $0x20] sm:$0xff] (!%p192_p7) }
  0x10   : > { %v881_v17 = vld [vmem:[%s1514_s1 + $0x138] sm:$0xff] (!%p192_p7)  ;;  %963 = vmatprep.subr.bf16.mxu1 (!%p192_p7), %v962_v8  ;;  %933 = vmatpush1.bf16.msra.mxu0 (!%p192_p7), %v932_v9  ;;  %v934_v18 = vpack.c.bf16 (!%p192_p7), %v279_v15, %v277_v12  ;;  %v278_v21 = vld [vmem:[%s1514_s1 + $0x30] sm:$0xff] (!%p192_p7)  ;;  %v878_v22 = vld [vmem:[%s1514_s1 + $0x120] sm:$0xff] (!%p192_p7) }
  0x11   : > { %v966_v19 = vpack.c.bf16 (!%p192_p7), %v881_v17, %v879_v16  ;;  %965 = vmatpush1.bf16.msra.mxu1 (!%p192_p7), %v964_v14  ;;  %v936_v23 = vpack.c.bf16 (!%p192_p7), %v278_v21, %v276_v20  ;;  %v880_v24 = vld [vmem:[%s1514_s1 + $0x130] sm:$0xff] (!%p192_p7)  ;;  %v281_v25 = vld [vmem:[%s1514_s1 + $0x48] sm:$0xff] (!%p192_p7)  ;;  %v283_v26 = vld [vmem:[%s1514_s1 + $0x58] sm:$0xff] (!%p192_p7) }
  0x12   : > { %935 = vmatprep.subr.bf16.mxu0 (!%p192_p7), %v934_v18  ;;  %v968_v27 = vpack.c.bf16 (!%p192_p7), %v880_v24, %v878_v22  ;;  %v938_v28 = vpack.c.bf16 (!%p192_p7), %v283_v26, %v281_v25  ;;  %v883_v29 = vld [vmem:[%s1514_s1 + $0x148] sm:$0xff] (!%p192_p7)  ;;  %v885_v30 = vld [vmem:[%s1514_s1 + $0x158] sm:$0xff] (!%p192_p7)  ;;  %v280_v31 = vld [vmem:[%s1514_s1 + $0x40] sm:$0xff] (!%p192_p7) }
  0x13   : > { %967 = vmatprep.subr.bf16.mxu1 %v966_v19  ;;  %v970_v32 = vpack.c.bf16 %v885_v30, %v883_v29  ;;  %v282_v33 = vld [vmem:[%s1514_s1 + $0x50] sm:$0xff]  ;;  %v882_v34 = vld [vmem:[%s1514_s1 + $0x140] sm:$0xff]  ;;  %v285_v37 = vld [vmem:[%s1514_s1 + $0x68] sm:$0xff]  ;;  %s1526_s26 = smov (!%p1254_p8, %s870_s26), 15 }
  0x14   : > { %v884_v35 = vld [vmem:[%s1514_s1 + $0x150] sm:$0xff]  ;;  %937 = vmatpush1.bf16.msra.mxu0 %v936_v23  ;;  %v940_v36 = vpack.c.bf16 %v282_v33, %v280_v31  ;;  %v287_v38 = vld [vmem:[%s1514_s1 + $0x78] sm:$0xff]  ;;  %v887_v39 = vld [vmem:[%s1514_s1 + $0x168] sm:$0xff]  ;;  %s871_s9 = sshll.u32 %s1526_s26, 3  ;;  %s226_s26 = sand.u32 1, %s1060_s12  }
  0x15   : > { %969 = vmatpush1.bf16.msra.mxu1 %v968_v27  ;;  %939 = vmatprep.subr.bf16.mxu0 %v938_v28  ;;  %v972_v40 = vpack.c.bf16 %v884_v35, %v882_v34  ;;  %v942_v41 = vpack.c.bf16 %v287_v38, %v285_v37  ;;  %v889_v42 = vld [vmem:[%s1514_s1 + $0x178] sm:$0xff]  ;;  %v284_v43 = vld [vmem:[%s1514_s1 + $0x60] sm:$0xff]  ;;  %v286_v44 = vld [vmem:[%s1514_s1 + $0x70] sm:$0xff]  ;;  %s1325_s27 = scalar_lea.vmem %s1515_s2, %s871_s9  ;;  %s1363_s5 = scalar_lea.vmem %s1513_s0, %s871_s9 }
  0x16   : > { %971 = vmatprep.subr.bf16.mxu1 %v970_v32  ;;  %v974_v45 = vpack.c.bf16 %v889_v42, %v887_v39  ;;  %v886_v46 = vld [vmem:[%s1514_s1 + $0x160] sm:$0xff]  ;;  %v888_v47 = vld [vmem:[%s1514_s1 + $0x170] sm:$0xff]  ;;  %v289_v48 = vld [vmem:[%s1514_s1 + $0x88] sm:$0xff]  ;;  %v944_v52 = vpack.c.bf16 %v286_v44, %v284_v43  ;;  %s869_s9 = sshll.u32 %s226_s26, 8  ;;  %s929_s12 = sshll.u32 (%p1132_p3), %s1068_s14, 7 }
  0x17   : > { %v291_v49 = vld [vmem:[%s1514_s1 + $0x98] sm:$0xff]  ;;  %v891_v50 = vld [vmem:[%s1514_s1 + $0x188] sm:$0xff]  ;;  %v976_v53 = vpack.c.bf16 %v888_v47, %v886_v46  ;;  %v288_v55 = vld [vmem:[%s1514_s1 + $0x80] sm:$0xff]  ;;  %s1435_s8 = scalar_lea.vmem (%p1132_p3), %s1516_s3, %s929_s12 }
  0x18   : > { %v893_v51 = vld [vmem:[%s1514_s1 + $0x198] sm:$0xff]  ;;  %941 = vmatpush1.bf16.msra.mxu0 %v940_v36  ;;  %v946_v54 = vpack.c.bf16 %v291_v49, %v289_v48  ;;  %v290_v56 = vld [vmem:[%s1514_s1 + $0x90] sm:$0xff]  ;;  %v890_v57 = vld [vmem:[%s1514_s1 + $0x180] sm:$0xff] }
  0x19   : > { %973 = vmatpush1.bf16.msra.mxu1 %v972_v40  ;;  %943 = vmatprep.subr.bf16.mxu0 %v942_v41  ;;  %v978_v58 = vpack.c.bf16 %v893_v51, %v891_v50  ;;  %v892_v59 = vld [vmem:[%s1514_s1 + $0x190] sm:$0xff]  ;;  %v293_v60 = vld [vmem:[%s1514_s1 + $0xa8] sm:$0xff]  ;;  %v295_v61 = vld [vmem:[%s1514_s1 + $0xb8] sm:$0xff]  ;;  %v948_v0 = vpack.c.bf16 %v290_v56, %v288_v55 }
  0x1a   : > { %975 = vmatprep.subr.bf16.mxu1 %v974_v45  ;;  %v895_v62 = vld [vmem:[%s1514_s1 + $0x1a8] sm:$0xff]  ;;  %v897_v63 = vld [vmem:[%s1514_s1 + $0x1b8] sm:$0xff]  ;;  %v980_v1 = vpack.c.bf16 %v892_v59, %v890_v57  ;;  %v950_v2 = vpack.c.bf16 %v295_v61, %v293_v60  ;;  %v292_v3 = vld [vmem:[%s1514_s1 + $0xa0] sm:$0xff] }
  0x1b   : > { %v294_v4 = vld [vmem:[%s1514_s1 + $0xb0] sm:$0xff]  ;;  %v894_v5 = vld [vmem:[%s1514_s1 + $0x1a0] sm:$0xff]  ;;  %v982_v6 = vpack.c.bf16 %v897_v63, %v895_v62  ;;  %v297_v9 = vld [vmem:[%s1514_s1 + $0xc8] sm:$0xff] }
  0x1c   : > { %945 = vmatpush1.bf16.msra.mxu0 %v944_v52  ;;  %v896_v8 = vld [vmem:[%s1514_s1 + $0x1b0] sm:$0xff]  ;;  %v299_v10 = vld [vmem:[%s1514_s1 + $0xd8] sm:$0xff]  ;;  %v899_v11 = vld [vmem:[%s1514_s1 + $0x1c8] sm:$0xff]  ;;  %v952_v13 = vpack.c.bf16 %v294_v4, %v292_v3 }
  0x1d   : > { %977 = vmatpush1.bf16.msra.mxu1 %v976_v53  ;;  %947 = vmatprep.subr.bf16.mxu0 %v946_v54  ;;  %v901_v12 = vld [vmem:[%s1514_s1 + $0x1d8] sm:$0xff]  ;;  %v984_v14 = vpack.c.bf16 %v896_v8, %v894_v5  ;;  %v954_v15 = vpack.c.bf16 %v299_v10, %v297_v9  ;;  %v296_v16 = vld [vmem:[%s1514_s1 + $0xc0] sm:$0xff]  ;;  %v298_v17 = vld [vmem:[%s1514_s1 + $0xd0] sm:$0xff] }
  0x1e   : > { %979 = vmatprep.subr.bf16.mxu1 %v978_v58  ;;  %v898_v18 = vld [vmem:[%s1514_s1 + $0x1c0] sm:$0xff]  ;;  %v986_v19 = vpack.c.bf16 %v901_v12, %v899_v11  ;;  %v900_v20 = vld [vmem:[%s1514_s1 + $0x1d0] sm:$0xff]  ;;  %v301_v21 = vld [vmem:[%s1514_s1 + $0xe8] sm:$0xff]  ;;  %v956_v25 = vpack.c.bf16 %v298_v17, %v296_v16 }
  0x1f   : > { %v303_v22 = vld [vmem:[%s1514_s1 + $0xf8] sm:$0xff]  ;;  %v903_v23 = vld [vmem:[%s1514_s1 + $0x1e8] sm:$0xff]  ;;  %v264_v26 = vld [vmem:[%s1325_s27] sm:$0xff]  ;;  %v988_v28 = vpack.c.bf16 %v900_v20, %v898_v18 }
  0x20   : > { %949 = vmatpush1.bf16.msra.mxu0 %v948_v0  ;;  %v905_v24 = vld [vmem:[%s1514_s1 + $0x1f8] sm:$0xff]  ;;  %v266_v27 = vld [vmem:[%s1325_s27 + $0x10] sm:$0xff]  ;;  %v958_v29 = vpack.c.bf16 %v303_v22, %v301_v21  ;;  %v300_v30 = vld [vmem:[%s1514_s1 + $0xe0] sm:$0xff]  ;;  %306 = vperm.xlu0 %1036, %v264_v26  }
  0x21   : > { %981 = vmatpush1.bf16.msra.mxu1 %v980_v1  ;;  %951 = vmatprep.subr.bf16.mxu0 %v950_v2  ;;  %v302_v31 = vld [vmem:[%s1514_s1 + $0xf0] sm:$0xff]  ;;  %v990_v32 = vpack.c.bf16 %v905_v24, %v903_v23  ;;  %v902_v33 = vld [vmem:[%s1514_s1 + $0x1e0] sm:$0xff]  ;;  %v265_v35 = vld [vmem:[%s1325_s27 + $0x8] sm:$0xff] }
  0x22   : > { %983 = vmatprep.subr.bf16.mxu1 %v982_v6  ;;  %v904_v34 = vld [vmem:[%s1514_s1 + $0x1f0] sm:$0xff]  ;;  %316 = vperm.xlu1 %1037, %v266_v27   ;;  %v960_v36 = vpack.c.bf16 %v302_v31, %v300_v30  ;;  %v267_v37 = vld [vmem:[%s1325_s27 + $0x18] sm:$0xff]  ;;  %v268_v39 = vld [vmem:[%s1325_s27 + $0x20] sm:$0xff] }
  0x23   : > { %v992_v38 = vpack.c.bf16 %v904_v34, %v902_v33  ;;  %v256_v40 = vld [vmem:[%s1363_s5] sm:$0xff]  ;;  %v269_v41 = vld [vmem:[%s1325_s27 + $0x28] sm:$0xff]  ;;  %v270_v42 = vld [vmem:[%s1325_s27 + $0x30] sm:$0xff] }
  0x24   : > { %953 = vmatpush1.bf16.msra.mxu0 %v952_v13  ;;  %311 = vperm.xlu0 %1036, %v265_v35   ;;  %v257_v43 = vld [vmem:[%s1363_s5 + $0x8] sm:$0xff]  ;;  %v271_v44 = vld [vmem:[%s1325_s27 + $0x38] sm:$0xff]  ;;  %v258_v45 = vld [vmem:[%s1363_s5 + $0x10] sm:$0xff]  ;;  %s1392_s27 = scalar_lea.vmem [#allocation2], %s869_s9 }
  0x25   : > { %985 = vmatpush1.bf16.msra.mxu1 %v984_v14  ;;  %955 = vmatprep.subr.bf16.mxu0 %v954_v15  ;;  %v259_v46 = vld [vmem:[%s1363_s5 + $0x18] sm:$0xff]  ;;  %v260_v47 = vld [vmem:[%s1363_s5 + $0x20] sm:$0xff]  ;;  %v261_v48 = vld [vmem:[%s1363_s5 + $0x28] sm:$0xff] }
  0x26   : > { %987 = vmatprep.subr.bf16.mxu1 %v986_v19  ;;  %321 = vperm.xlu1 %1037, %v267_v37   ;;  %v262_v49 = vld [vmem:[%s1363_s5 + $0x30] sm:$0xff]  ;;  %v263_v50 = vld [vmem:[%s1363_s5 + $0x38] sm:$0xff] }
  0x28   : > { %957 = vmatpush1.bf16.msra.mxu0 %v956_v25  ;;  %326 = vperm.xlu0 %1036, %v268_v39  }
  0x29   : > { %989 = vmatpush1.bf16.msra.mxu1 %v988_v28  ;;  %959 = vmatprep.subr.bf16.mxu0 %v958_v29 }
  0x2a   : > { %991 = vmatprep.subr.bf16.mxu1 %v990_v32  ;;  %331 = vperm.xlu1 %1037, %v269_v41  }
  0x2c   : > { %961 = vmatpush1.bf16.msra.mxu0 %v960_v36  ;;  %336 = vperm.xlu0 %1036, %v270_v42  }
  0x2d   : > { %993 = vmatpush1.bf16.msra.mxu1 %v992_v38 }
  0x2e   : > { %341 = vperm.xlu1 %1037, %v271_v44  }
  0x2f   : > { %409 = vmatmul.mubr.f32.vlgmr.msra.gmra.mrb[0].mxu0 %v256_v40 }
  0x30   : > { %587 = vmatmul.mubr.f32.vlgmr.msra.gmra.mrb[0].mxu1 %v256_v40  ;;  %414 = vmatprep.mubr.f32.mxu0 %v1078_v7 }
  0x31   : > { %592 = vmatprep.mubr.f32.mxu1 %v1078_v7 }
  0x33   : > { %415 = vmatmul.mubr.f32.gmra.mrb[2].mxu0 %v257_v43 }
  0x34   : > { %593 = vmatmul.mubr.f32.gmra.mrb[2].mxu1 %v257_v43  ;;  %420 = vmatprep.mubr.f32.mxu0 %v1078_v7 }
  0x35   : > { %598 = vmatprep.mubr.f32.mxu1 %v1078_v7 }
  0x37   : > { %421 = vmatmul.mubr.f32.gmra.mrb[4].mxu0 %v258_v45 }
  0x38   : > { %599 = vmatmul.mubr.f32.gmra.mrb[4].mxu1 %v258_v45  ;;  %426 = vmatprep.mubr.f32.mxu0 %v1078_v7 }
  0x39   : > { %604 = vmatprep.mubr.f32.mxu1 %v1078_v7 }
  0x3b   : > { %427 = vmatmul.mubr.f32.gmra.mrb[6].mxu0 %v259_v46 }
  0x3c   : > { %605 = vmatmul.mubr.f32.gmra.mrb[6].mxu1 %v259_v46  ;;  %432 = vmatprep.mubr.f32.mxu0 %v1078_v7 }
  0x3d   : > { %610 = vmatprep.mubr.f32.mxu1 %v1078_v7 }
  0x3f   : > { %433 = vmatmul.mubr.f32.gmra.mrb[8].mxu0 %v260_v47 }
  0x40   : > { %611 = vmatmul.mubr.f32.gmra.mrb[8].mxu1 %v260_v47  ;;  %438 = vmatprep.mubr.f32.mxu0 %v1078_v7 }
  0x41   : > { %616 = vmatprep.mubr.f32.mxu1 %v1078_v7 }
  0x43   : > { %439 = vmatmul.mubr.f32.gmra.mrb[10].mxu0 %v261_v48 }
  0x44   : > { %617 = vmatmul.mubr.f32.gmra.mrb[10].mxu1 %v261_v48  ;;  %444 = vmatprep.mubr.f32.mxu0 %v1078_v7 }
  0x45   : > { %622 = vmatprep.mubr.f32.mxu1 %v1078_v7 }
  0x47   : > { %445 = vmatmul.mubr.f32.gmra.mrb[12].mxu0 %v262_v49 }
  0x48   : > { %623 = vmatmul.mubr.f32.gmra.mrb[12].mxu1 %v262_v49  ;;  %450 = vmatprep.mubr.f32.mxu0 %v1078_v7 }
  0x49   : > { %628 = vmatprep.mubr.f32.mxu1 %v1078_v7 }
  0x4b   : > { %451 = vmatmul.mubr.f32.gmra.mrb[14].mxu0 %v263_v50 }
  0x4c   : > { %629 = vmatmul.mubr.f32.gmra.mrb[14].mxu1 %v263_v50 }
  0x9f   : > { %v307_v51 = vpop.permute.xlu0 %306 }
  0xa1   : > { %v317_v5 = vpop.permute.xlu1 %316 }
  0xa3   : > { %v312_v59 = vpop.permute.xlu0 %311 }
  0xa5   : > { %v322_v24 = vpop.permute.xlu1 %321 }
  0xa7   : > { %v327_v37 = vpop.permute.xlu0 %326 }
  0xa9   : > { %v332_v49 = vpop.permute.xlu1 %331 }
 0x102   : > { %v410_v52 = vpop.f32.mrb[0].mxu0 }
 0x103   : > { %v411_v53 = vadd.f32 %v410_v52, %v307_v51  ;;  %v588_v54 = vpop.f32.mrb[0].mxu1  ;;  %v412_v55 = vpop.f32.mrb[1].mxu0 }
 0x104   : > { %v589_v56 = vadd.f32 %v588_v54, %v307_v51  ;;  %v413_v57 = vadd.f32 %v412_v55, %v307_v51  ;;  %v590_v58 = vpop.f32.mrb[1].mxu1 }
 0x105   : > { %v457_v60 = vmax.f32 %v411_v53, 0.0  ;;  %v591_v61 = vadd.f32 %v590_v58, %v307_v51 }
 0x106   : > { %v635_v62 = vmax.f32 %v589_v56, 0.0  ;;  %v458_v63 = vmax.f32 %v413_v57, 0.0  ;;  %v416_v0 = vpop.f32.mrb[2].mxu0 }
 0x107   : > { %473 = vst [vmem:[%s1392_s27] sm:$0xff] %v457_v60  ;;  %v636_v7 = vmax.f32 %v591_v61, 0.0  ;;  %v417_v1 = vadd.f32 %v416_v0, %v312_v59  ;;  %v594_v2 = vpop.f32.mrb[2].mxu1  ;;  %v418_v3 = vpop.f32.mrb[3].mxu0 }
 0x108   : > { %906 = vst [vmem:[%s1392_s27 + $0x80] sm:$0xff] %v635_v62  ;;  %474 = vst [vmem:[%s1392_s27 + $0x8] sm:$0xff] %v458_v63  ;;  %v595_v4 = vadd.f32 %v594_v2, %v312_v59  ;;  %v419_v6 = vadd.f32 %v418_v3, %v312_v59  ;;  %v596_v8 = vpop.f32.mrb[3].mxu1  ;;  %v337_v62 = vpop.permute.xlu0 %336 }
 0x109   : > { %907 = vst [vmem:[%s1392_s27 + $0x88] sm:$0xff] %v636_v7  ;;  %v459_v9 = vmax.f32 %v417_v1, 0.0  ;;  %v597_v10 = vadd.f32 %v596_v8, %v312_v59 }
 0x10a   : > { %v637_v11 = vmax.f32 %v595_v4, 0.0  ;;  %v460_v12 = vmax.f32 %v419_v6, 0.0  ;;  %v422_v13 = vpop.f32.mrb[4].mxu0 }
 0x10b   : > { %475 = vst [vmem:[%s1392_s27 + $0x10] sm:$0xff] %v459_v9  ;;  %v638_v14 = vmax.f32 %v597_v10, 0.0  ;;  %v423_v15 = vadd.f32 %v422_v13, %v317_v5  ;;  %v600_v16 = vpop.f32.mrb[4].mxu1  ;;  %v424_v17 = vpop.f32.mrb[5].mxu0 }
 0x10c   : > { %908 = vst [vmem:[%s1392_s27 + $0x90] sm:$0xff] %v637_v11  ;;  %476 = vst [vmem:[%s1392_s27 + $0x18] sm:$0xff] %v460_v12  ;;  %v601_v18 = vadd.f32 %v600_v16, %v317_v5  ;;  %v425_v19 = vadd.f32 %v424_v17, %v317_v5  ;;  %v602_v20 = vpop.f32.mrb[5].mxu1  ;;  %v342_v11 = vpop.permute.xlu1 %341 }
 0x10d   : > { %909 = vst [vmem:[%s1392_s27 + $0x98] sm:$0xff] %v638_v14  ;;  %v461_v21 = vmax.f32 %v423_v15, 0.0  ;;  %v603_v22 = vadd.f32 %v602_v20, %v317_v5 }
 0x10e   : > { %v639_v23 = vmax.f32 %v601_v18, 0.0  ;;  %v462_v25 = vmax.f32 %v425_v19, 0.0  ;;  %v428_v26 = vpop.f32.mrb[6].mxu0 }
 0x10f   : > { %477 = vst [vmem:[%s1392_s27 + $0x20] sm:$0xff] %v461_v21  ;;  %v640_v27 = vmax.f32 %v603_v22, 0.0  ;;  %v429_v28 = vadd.f32 %v428_v26, %v322_v24  ;;  %v606_v29 = vpop.f32.mrb[6].mxu1  ;;  %v430_v30 = vpop.f32.mrb[7].mxu0 }
 0x110   : > { %910 = vst [vmem:[%s1392_s27 + $0xa0] sm:$0xff] %v639_v23  ;;  %478 = vst [vmem:[%s1392_s27 + $0x28] sm:$0xff] %v462_v25  ;;  %v607_v31 = vadd.f32 %v606_v29, %v322_v24  ;;  %v431_v32 = vadd.f32 %v430_v30, %v322_v24  ;;  %v608_v33 = vpop.f32.mrb[7].mxu1 }
 0x111   : > { %911 = vst [vmem:[%s1392_s27 + $0xa8] sm:$0xff] %v640_v27  ;;  %v463_v34 = vmax.f32 %v429_v28, 0.0  ;;  %v609_v35 = vadd.f32 %v608_v33, %v322_v24  ;;  %v696_v27 = vld [vmem:[%s1392_s27] sm:$0xff] (%p1132_p3)  ;;  %v698_v28 = vld [vmem:[%s1392_s27 + $0x8] sm:$0xff] (%p1132_p3) }
 0x112   : > { %v641_v36 = vmax.f32 %v607_v31, 0.0  ;;  %v464_v38 = vmax.f32 %v431_v32, 0.0  ;;  %v434_v39 = vpop.f32.mrb[8].mxu0  ;;  %v700_v29 = vld [vmem:[%s1392_s27 + $0x10] sm:$0xff] (%p1132_p3)  ;;  %697 = vst [vmem:[%s1435_s8] sm:$0xff] (%p1132_p3), %v696_v27  ;;  %699 = vst [vmem:[%s1435_s8 + $0x8] sm:$0xff] (%p1132_p3), %v698_v28 }
 0x113   : > { %479 = vst [vmem:[%s1392_s27 + $0x30] sm:$0xff] %v463_v34  ;;  %v642_v40 = vmax.f32 %v609_v35, 0.0  ;;  %v435_v41 = vadd.f32 %v434_v39, %v327_v37  ;;  %v612_v42 = vpop.f32.mrb[8].mxu1  ;;  %v436_v43 = vpop.f32.mrb[9].mxu0  ;;  %v702_v30 = vld [vmem:[%s1392_s27 + $0x18] sm:$0xff] (%p1132_p3)  ;;  %701 = vst [vmem:[%s1435_s8 + $0x10] sm:$0xff] (%p1132_p3), %v700_v29 }
 0x114   : > { %912 = vst [vmem:[%s1392_s27 + $0xb0] sm:$0xff] %v641_v36  ;;  %480 = vst [vmem:[%s1392_s27 + $0x38] sm:$0xff] %v464_v38  ;;  %v613_v44 = vadd.f32 %v612_v42, %v327_v37  ;;  %v437_v45 = vadd.f32 %v436_v43, %v327_v37  ;;  %v614_v46 = vpop.f32.mrb[9].mxu1  ;;  %v728_v43 = vld [vmem:[%s1392_s27 + $0x80] sm:$0xff] (%p1132_p3) }
 0x115   : > { %913 = vst [vmem:[%s1392_s27 + $0xb8] sm:$0xff] %v642_v40  ;;  %v465_v47 = vmax.f32 %v435_v41, 0.0  ;;  %v615_v48 = vadd.f32 %v614_v46, %v327_v37  ;;  %703 = vst [vmem:[%s1435_s8 + $0x18] sm:$0xff] (%p1132_p3), %v702_v30  ;;  %v734_v46 = vld [vmem:[%s1392_s27 + $0x98] sm:$0xff] (%p1132_p3) }
 0x116   : > { %v643_v50 = vmax.f32 %v613_v44, 0.0  ;;  %v466_v51 = vmax.f32 %v437_v45, 0.0  ;;  %v440_v52 = vpop.f32.mrb[10].mxu0  ;;  %v704_v31 = vld [vmem:[%s1392_s27 + $0x20] sm:$0xff] (%p1132_p3)  ;;  %v730_v44 = vld [vmem:[%s1392_s27 + $0x88] sm:$0xff] (%p1132_p3)  ;;  %729 = vst [vmem:[%s1435_s8 + $0x100] sm:$0xff] (%p1132_p3), %v728_v43 }
 0x117   : > { %481 = vst [vmem:[%s1392_s27 + $0x40] sm:$0xff] %v465_v47  ;;  %v644_v53 = vmax.f32 %v615_v48, 0.0  ;;  %v441_v54 = vadd.f32 %v440_v52, %v332_v49  ;;  %v618_v55 = vpop.f32.mrb[10].mxu1  ;;  %v442_v56 = vpop.f32.mrb[11].mxu0  ;;  %v706_v32 = vld [vmem:[%s1392_s27 + $0x28] sm:$0xff] (%p1132_p3)  ;;  %705 = vst [vmem:[%s1435_s8 + $0x20] sm:$0xff] (%p1132_p3), %v704_v31 }
 0x118   : > { %914 = vst [vmem:[%s1392_s27 + $0xc0] sm:$0xff] %v643_v50  ;;  %482 = vst [vmem:[%s1392_s27 + $0x48] sm:$0xff] %v466_v51  ;;  %v619_v57 = vadd.f32 %v618_v55, %v332_v49  ;;  %v443_v58 = vadd.f32 %v442_v56, %v332_v49  ;;  %v620_v59 = vpop.f32.mrb[11].mxu1  ;;  %v732_v45 = vld [vmem:[%s1392_s27 + $0x90] sm:$0xff] (%p1132_p3)  ;;  %v736_v47 = vld [vmem:[%s1392_s27 + $0xa0] sm:$0xff] (%p1132_p3) }
 0x119   : > { %915 = vst [vmem:[%s1392_s27 + $0xc8] sm:$0xff] %v644_v53  ;;  %v467_v60 = vmax.f32 %v441_v54, 0.0  ;;  %v621_v61 = vadd.f32 %v620_v59, %v332_v49  ;;  %707 = vst [vmem:[%s1435_s8 + $0x28] sm:$0xff] (%p1132_p3), %v706_v32  ;;  %v738_v48 = vld [vmem:[%s1392_s27 + $0xa8] sm:$0xff] (%p1132_p3) }
 0x11a   : > { %v645_v63 = vmax.f32 %v619_v57, 0.0  ;;  %v468_v0 = vmax.f32 %v443_v58, 0.0  ;;  %v446_v7 = vpop.f32.mrb[12].mxu0  ;;  %v708_v33 = vld [vmem:[%s1392_s27 + $0x30] sm:$0xff] (%p1132_p3)  ;;  %731 = vst [vmem:[%s1435_s8 + $0x108] sm:$0xff] (%p1132_p3), %v730_v44  ;;  %733 = vst [vmem:[%s1435_s8 + $0x110] sm:$0xff] (%p1132_p3), %v732_v45 }
 0x11b   : > { %483 = vst [vmem:[%s1392_s27 + $0x50] sm:$0xff] %v467_v60  ;;  %v646_v1 = vmax.f32 %v621_v61, 0.0  ;;  %v447_v2 = vadd.f32 %v446_v7, %v337_v62  ;;  %v624_v3 = vpop.f32.mrb[12].mxu1  ;;  %v448_v4 = vpop.f32.mrb[13].mxu0  ;;  %v710_v34 = vld [vmem:[%s1392_s27 + $0x38] sm:$0xff] (%p1132_p3)  ;;  %709 = vst [vmem:[%s1435_s8 + $0x30] sm:$0xff] (%p1132_p3), %v708_v33 }
 0x11c   : > { %916 = vst [vmem:[%s1392_s27 + $0xd0] sm:$0xff] %v645_v63  ;;  %484 = vst [vmem:[%s1392_s27 + $0x58] sm:$0xff] %v468_v0  ;;  %v625_v5 = vadd.f32 %v624_v3, %v337_v62  ;;  %v449_v6 = vadd.f32 %v448_v4, %v337_v62  ;;  %v626_v8 = vpop.f32.mrb[13].mxu1  ;;  %v740_v49 = vld [vmem:[%s1392_s27 + $0xb0] sm:$0xff] (%p1132_p3)  ;;  %v742_v50 = vld [vmem:[%s1392_s27 + $0xb8] sm:$0xff] (%p1132_p3) }
 0x11d   : > { %917 = vst [vmem:[%s1392_s27 + $0xd8] sm:$0xff] %v646_v1  ;;  %v469_v9 = vmax.f32 %v447_v2, 0.0  ;;  %v627_v10 = vadd.f32 %v626_v8, %v337_v62  ;;  %711 = vst [vmem:[%s1435_s8 + $0x38] sm:$0xff] (%p1132_p3), %v710_v34 }
 0x11e   : > { %v647_v12 = vmax.f32 %v625_v5, 0.0  ;;  %v470_v13 = vmax.f32 %v449_v6, 0.0  ;;  %v452_v14 = vpop.f32.mrb[14].mxu0  ;;  %v712_v35 = vld [vmem:[%s1392_s27 + $0x40] sm:$0xff] (%p1132_p3)  ;;  %735 = vst [vmem:[%s1435_s8 + $0x118] sm:$0xff] (%p1132_p3), %v734_v46  ;;  %737 = vst [vmem:[%s1435_s8 + $0x120] sm:$0xff] (%p1132_p3), %v736_v47 }
 0x11f   : > { %485 = vst [vmem:[%s1392_s27 + $0x60] sm:$0xff] %v469_v9  ;;  %v648_v15 = vmax.f32 %v627_v10, 0.0  ;;  %v453_v16 = vadd.f32 %v452_v14, %v342_v11  ;;  %v630_v17 = vpop.f32.mrb[14].mxu1  ;;  %v454_v18 = vpop.f32.mrb[15].mxu0  ;;  %674 = sbr.rel (!%p1132_p3) target bundleno = 302 (0x12e), region = 36  ;;  %713 = vst [vmem:[%s1435_s8 + $0x40] sm:$0xff] (%p1132_p3), %v712_v35 }
 0x120   : > { %918 = vst [vmem:[%s1392_s27 + $0xe0] sm:$0xff] %v647_v12  ;;  %486 = vst [vmem:[%s1392_s27 + $0x68] sm:$0xff] %v470_v13  ;;  %v631_v19 = vadd.f32 %v630_v17, %v342_v11  ;;  %v455_v20 = vadd.f32 %v454_v18, %v342_v11  ;;  %v632_v21 = vpop.f32.mrb[15].mxu1  ;;  %v714_v36 = vld [vmem:[%s1392_s27 + $0x48] sm:$0xff] (%p1132_p3)  ;;  %v744_v51 = vld [vmem:[%s1392_s27 + $0xc0] sm:$0xff] (%p1132_p3) }
 0x121   : > { %919 = vst [vmem:[%s1392_s27 + $0xe8] sm:$0xff] %v648_v15  ;;  %v471_v22 = vmax.f32 %v453_v16, 0.0  ;;  %v633_v23 = vadd.f32 %v632_v21, %v342_v11  ;;  %715 = vst [vmem:[%s1435_s8 + $0x48] sm:$0xff] (%p1132_p3), %v714_v36  ;;  %v746_v52 = vld [vmem:[%s1392_s27 + $0xc8] sm:$0xff] (%p1132_p3) }
 0x122   : > { %v649_v24 = vmax.f32 %v631_v19, 0.0  ;;  %v472_v25 = vmax.f32 %v455_v20, 0.0  ;;  %v716_v37 = vld [vmem:[%s1392_s27 + $0x50] sm:$0xff] (%p1132_p3)  ;;  %739 = vst [vmem:[%s1435_s8 + $0x128] sm:$0xff] (%p1132_p3), %v738_v48  ;;  %741 = vst [vmem:[%s1435_s8 + $0x130] sm:$0xff] (%p1132_p3), %v740_v49 }
 0x123   : > { %487 = vst [vmem:[%s1392_s27 + $0x70] sm:$0xff] %v471_v22  ;;  %v650_v26 = vmax.f32 %v633_v23, 0.0  ;;  %v718_v38 = vld [vmem:[%s1392_s27 + $0x58] sm:$0xff] (%p1132_p3)  ;;  %717 = vst [vmem:[%s1435_s8 + $0x50] sm:$0xff] (%p1132_p3), %v716_v37  ;;  %v748_v53 = vld [vmem:[%s1392_s27 + $0xd0] sm:$0xff] (%p1132_p3) }
 0x124   : > { %920 = vst [vmem:[%s1392_s27 + $0xf0] sm:$0xff] %v649_v24  ;;  %488 = vst [vmem:[%s1392_s27 + $0x78] sm:$0xff] %v472_v25  ;;  %v750_v54 = vld [vmem:[%s1392_s27 + $0xd8] sm:$0xff] (%p1132_p3) }
 0x125   : > { %921 = vst [vmem:[%s1392_s27 + $0xf8] sm:$0xff] %v650_v26  ;;  %719 = vst [vmem:[%s1435_s8 + $0x58] sm:$0xff] (%p1132_p3), %v718_v38 }
 0x126   : > { %v720_v39 = vld [vmem:[%s1392_s27 + $0x60] sm:$0xff]  ;;  %743 = vst [vmem:[%s1435_s8 + $0x138] sm:$0xff] %v742_v50  ;;  %745 = vst [vmem:[%s1435_s8 + $0x140] sm:$0xff] %v744_v51 }
 0x127   : > { %v722_v40 = vld [vmem:[%s1392_s27 + $0x68] sm:$0xff]  ;;  %721 = vst [vmem:[%s1435_s8 + $0x60] sm:$0xff] %v720_v39  ;;  %747 = vst [vmem:[%s1435_s8 + $0x148] sm:$0xff] %v746_v52  ;;  %v752_v55 = vld [vmem:[%s1392_s27 + $0xe0] sm:$0xff] }
 0x128   : > { %723 = vst [vmem:[%s1435_s8 + $0x68] sm:$0xff] %v722_v40  ;;  %749 = vst [vmem:[%s1435_s8 + $0x150] sm:$0xff] %v748_v53  ;;  %v754_v56 = vld [vmem:[%s1392_s27 + $0xe8] sm:$0xff] }
 0x129   : > { %751 = vst [vmem:[%s1435_s8 + $0x158] sm:$0xff] %v750_v54  ;;  %753 = vst [vmem:[%s1435_s8 + $0x160] sm:$0xff] %v752_v55 }
 0x12a   : > { %v724_v41 = vld [vmem:[%s1392_s27 + $0x70] sm:$0xff]  ;;  %755 = vst [vmem:[%s1435_s8 + $0x168] sm:$0xff] %v754_v56 }
 0x12b   : > { %725 = vst [vmem:[%s1435_s8 + $0x70] sm:$0xff] %v724_v41  ;;  %v726_v42 = vld [vmem:[%s1392_s27 + $0x78] sm:$0xff]  ;;  %v756_v57 = vld [vmem:[%s1392_s27 + $0xf0] sm:$0xff] }
 0x12c   : > { %727 = vst [vmem:[%s1435_s8 + $0x78] sm:$0xff] %v726_v42  ;;  %v758_v58 = vld [vmem:[%s1392_s27 + $0xf8] sm:$0xff]  ;;  %757 = vst [vmem:[%s1435_s8 + $0x170] sm:$0xff] %v756_v57 }
 0x12d   : > { %759 = vst [vmem:[%s1435_s8 + $0x178] sm:$0xff] %v758_v58 }
 0x12e PF: > { %s13_s16 = sadd.s32 1, %s1076_s16   ;;  %s1519_s12 = smov %s1064_s13 }
 0x12f   : > { %p10_p9 = scmp.ge.s32.totalorder %s13_s16, 4   ;;  %s1520_s13 = smov %s1141_s22 }
 0x130   : > { %s1521_s14 = smov %s1072_s15  ;;  %s1522_s15 = smov %s1524_s18 }
 0x131   :  { %12 = sbr.rel (!%p10_p9) target bundleno = 3 (0x3), region = 93 }

</bundles_post_ra>
